<compile_context>
chip_gen: v5e
topology: v5e:2x2
jax: 0.10.0
libtpu: 0.0.40
codegen_flags: <defaults>
</compile_context>

<pallas_src>
import jax
import jax.numpy as jnp
from jax.experimental import pallas as pl
from jax.experimental.pallas import tpu as pltpu


def _transition_kernel(x_ref, scale_ref, shift_ref, w_ref, o_ref):
    """x_ref:     (4, tm, Cin)  the 4 pooling taps for a tile of output pixels
                                (activation dtype, e.g. bf16).
       scale_ref: (1, Cin) f32  folded BatchNorm scale.
       shift_ref: (1, Cin) f32  folded BatchNorm shift.
       w_ref:     (Cin, tn)     1x1 conv weight (0.25 avg-pool factor folded in).
       o_ref:     (tm, tn) f32  pooled output pixels.
    """
    scale = scale_ref[...]                       # (1, Cin), broadcasts over rows
    shift = shift_ref[...]

    def bn_relu(tap):                            # BN (folded) + ReLU, in f32
        return jnp.maximum(tap.astype(jnp.float32) * scale + shift, 0.0)

    # Pooling commutes with the linear conv: sum the 4 taps, then ONE matmul.
    s = (bn_relu(x_ref[0]) + bn_relu(x_ref[1])
         + bn_relu(x_ref[2]) + bn_relu(x_ref[3]))          # (tm, Cin) f32

    o_ref[...] = jnp.dot(s.astype(w_ref.dtype), w_ref[...],
                         preferred_element_type=jnp.float32).astype(o_ref.dtype)


def _pick_tile_m(M, Cin, Cout, act_bytes):
    """Largest power-of-two pixel tile (>=8) that (a) keeps the double-buffered
    blocks under ~24 MiB (fits the 32 MiB scoped-VMEM default on v5e/v6e/v7x)
    and (b) leaves at least 2 grid steps so both v7x TensorCores get work."""
    budget = 24 * 1024 * 1024
    tm = 1024
    while tm > 8:
        need = (2 * 4 * tm * Cin * act_bytes      # double-buffered input taps
                + 2 * tm * Cout * 4               # double-buffered f32 output
                + Cin * Cout * 4)                 # weight tile
        if need <= budget:
            break
        tm //= 2
    while tm > 8 and pl.cdiv(M, tm) < 2:
        tm //= 2
    return max(8, tm)


def transition_forward(x_nchw, gamma, beta, running_mean, running_var, conv_w,
                       eps=1e-5, activation_dtype=jnp.bfloat16):
    """Matches Transition.forward in inference mode (BN uses running stats)."""
    N, Cin, H, W = x_nchw.shape
    Cout = conv_w.shape[0]
    assert H % 2 == 0 and W % 2 == 0
    Hp, Wp = H // 2, W // 2
    M = N * Hp * Wp

    # ---- glue: ONE fused transpose/reshape producing the 4 pooling taps ------
    # (N,C,H,W) -> (ph,pw,N,Hp,Wp,C) -> (4, M, C).  Pure data movement; XLA emits
    # a single copy (same HBM traffic as the NCHW->NHWC transpose alone).
    x6 = x_nchw.reshape(N, Cin, Hp, 2, Wp, 2)
    taps = jnp.transpose(x6, (3, 5, 0, 2, 4, 1)).astype(activation_dtype)
    x4 = taps.reshape(4, M, Cin)

    # ---- fold BatchNorm into per-channel scale/shift (f32) -------------------
    inv_std = 1.0 / jnp.sqrt(running_var.astype(jnp.float32) + eps)
    scale = (gamma.astype(jnp.float32) * inv_std).reshape(1, Cin)
    shift = (beta.astype(jnp.float32)
             - running_mean.astype(jnp.float32) * gamma.astype(jnp.float32)
             * inv_std).reshape(1, Cin)

    # ---- 1x1 conv weight: (Cin, Cout), 0.25 pooling factor folded in ---------
    # bf16 operands for the MXU only when channels are big enough to matter.
    mxu_dtype = jnp.bfloat16 if Cin >= 256 else jnp.float32
    w = (conv_w.reshape(Cout, Cin).T.astype(jnp.float32) * 0.25).astype(mxu_dtype)

    # ---- tiling ---------------------------------------------------------------
    act_bytes = jnp.dtype(activation_dtype).itemsize
    tm = _pick_tile_m(M, Cin, Cout, act_bytes)
    gm = pl.cdiv(M, tm)
    Mp = gm * tm
    if Mp != M:                                   # cdiv grid + pad (no giant block)
        x4 = jnp.pad(x4, ((0, 0), (0, Mp - M), (0, 0)))

    if Cout > 512 and Cout % 256 == 0:            # lane-dense Cout tiles when large
        tn = 256
    elif Cout > 512 and Cout % 128 == 0:
        tn = 128
    else:
        tn = Cout
    gn = Cout // tn

    out_flat = pl.pallas_call(
        _transition_kernel,
        out_shape=jax.ShapeDtypeStruct((Mp, Cout), jnp.float32),
        grid_spec=pltpu.PrefetchScalarGridSpec(
            num_scalar_prefetch=0,
            # Cout axis iterates innermost -> activation tile is not re-fetched.
            grid=(gm, gn),
            in_specs=[
                pl.BlockSpec((4, tm, Cin), lambda i, j: (0, i, 0)),
                pl.BlockSpec((1, Cin), lambda i, j: (0, 0)),
                pl.BlockSpec((1, Cin), lambda i, j: (0, 0)),
                pl.BlockSpec((Cin, tn), lambda i, j: (0, j)),
            ],
            out_specs=pl.BlockSpec((tm, tn), lambda i, j: (i, j)),
        ),
        compiler_params=pltpu.CompilerParams(
            dimension_semantics=("parallel", "parallel")),
    )(x4, scale, shift, w)

    out = out_flat[:M].reshape(N, Hp, Wp, Cout)
    return jnp.transpose(out, (0, 3, 1, 2))                  # back to NCHW


def _reference_forward(x_nchw, gamma, beta, running_mean, running_var, conv_w,
                       eps=1e-5):
    """Pure-JAX f32 reference (inference-mode BN)."""
    N, Cin, H, W = x_nchw.shape
    Cout = conv_w.shape[0]
    xh = (x_nchw - running_mean[None, :, None, None]) / jnp.sqrt(
        running_var[None, :, None, None] + eps)
    xh = xh * gamma[None, :, None, None] + beta[None, :, None, None]
    xh = jnp.maximum(xh, 0.0)
    conv = jnp.einsum('nchw,oc->nohw', xh, conv_w.reshape(Cout, Cin))
    pooled = conv.reshape(N, Cout, H // 2, 2, W // 2, 2).mean(axis=(3, 5))
    return pooled


if __name__ == "__main__":
    key = jax.random.PRNGKey(0)
    k_x, k_g, k_b, k_m, k_v, k_w = jax.random.split(key, 6)

    N, Cin, H, W = 2, 4, 16, 16
    Cout = Cin // 2  # DenseNet transition typically halves channels

    x = jax.random.normal(k_x, (N, Cin, H, W), jnp.float32)

    # deterministic "trained-looking" parameters (BN in inference mode)
    gamma = 0.5 + jax.random.uniform(k_g, (Cin,), jnp.float32)
    beta = 0.1 * jax.random.normal(k_b, (Cin,), jnp.float32)
    running_mean = 0.1 * jax.random.normal(k_m, (Cin,), jnp.float32)
    running_var = 0.5 + jax.random.uniform(k_v, (Cin,), jnp.float32)
    conv_w = jax.random.normal(k_w, (Cout, Cin, 1, 1), jnp.float32) / jnp.sqrt(Cin)

    ref = _reference_forward(x, gamma, beta, running_mean, running_var, conv_w)

    # f32 activation path: must match the reference tightly.
    out_f32 = transition_forward(x, gamma, beta, running_mean, running_var,
                                 conv_w, activation_dtype=jnp.float32)
    out_f32 = jax.block_until_ready(out_f32)
    assert out_f32.shape == (N, Cout, H // 2, W // 2), out_f32.shape
    assert jnp.allclose(out_f32, ref, rtol=1e-5, atol=1e-5), (
        float(jnp.max(jnp.abs(out_f32 - ref))))

    # bf16 activation stream (default, halves HBM read traffic): looser tolerance.
    out_bf16 = transition_forward(x, gamma, beta, running_mean, running_var,
                                  conv_w)  # activation_dtype=bf16 default
    out_bf16 = jax.block_until_ready(out_bf16)
    assert out_bf16.shape == (N, Cout, H // 2, W // 2), out_bf16.shape
    assert jnp.allclose(out_bf16, ref, rtol=5e-2, atol=5e-2), (
        float(jnp.max(jnp.abs(out_bf16 - ref))))

    print("KERNEL_OK")
</pallas_src>

<mosaic_0001>
module attributes {stable_mosaic.version = 11 : i64} {
  func.func @_transition_kernel(%arg0: i32, %arg1: i32, %arg2: memref<4x64x4xf32, #tpu.memory_space<vmem>>, %arg3: memref<1x4xf32, #tpu.memory_space<vmem>>, %arg4: memref<1x4xf32, #tpu.memory_space<vmem>>, %arg5: memref<4x2xf32, #tpu.memory_space<vmem>>, %arg6: memref<64x2xf32, #tpu.memory_space<vmem>>) attributes {dimension_semantics = [#tpu.dimension_semantics<parallel>, #tpu.dimension_semantics<parallel>], iteration_bounds = array<i64: 2, 1>, scalar_prefetch = 0 : i64, scratch_operands = 0 : i64, tpu.core_type = #tpu.core_type<tc>, window_params = [{transform_indices = @transform_0, window_bounds = array<i64: 4, 64, 4>}, {pipeline_mode = #tpu.pipeline_mode<synchronous>, transform_indices = @transform_1, window_bounds = array<i64: 1, 4>}, {pipeline_mode = #tpu.pipeline_mode<synchronous>, transform_indices = @transform_2, window_bounds = array<i64: 1, 4>}, {transform_indices = @transform_3, window_bounds = array<i64: 4, 2>}, {transform_indices = @transform_4, window_bounds = array<i64: 64, 2>}]} {
    %c0 = arith.constant 0 : index
    %c0_0 = arith.constant 0 : index
    %0 = vector.load %arg3[%c0, %c0_0] : memref<1x4xf32, #tpu.memory_space<vmem>>, vector<1x4xf32>
    %c0_1 = arith.constant 0 : index
    %c0_2 = arith.constant 0 : index
    %1 = vector.load %arg4[%c0_1, %c0_2] : memref<1x4xf32, #tpu.memory_space<vmem>>, vector<1x4xf32>
    %c0_3 = arith.constant 0 : index
    %c0_4 = arith.constant 0 : index
    %c0_5 = arith.constant 0 : index
    %2 = vector.load %arg2[%c0_3, %c0_4, %c0_5] : memref<4x64x4xf32, #tpu.memory_space<vmem>>, vector<1x64x4xf32>
    %3 = vector.shape_cast %2 : vector<1x64x4xf32> to vector<64x4xf32>
    %4 = vector.broadcast %0 : vector<1x4xf32> to vector<64x4xf32>
    %5 = arith.mulf %3, %4 : vector<64x4xf32>
    %6 = vector.broadcast %1 : vector<1x4xf32> to vector<64x4xf32>
    %7 = arith.addf %5, %6 : vector<64x4xf32>
    %cst = arith.constant 0.000000e+00 : f32
    %8 = vector.broadcast %cst : f32 to vector<64x4xf32>
    %9 = arith.maximumf %7, %8 : vector<64x4xf32>
    %c1 = arith.constant 1 : index
    %c0_6 = arith.constant 0 : index
    %c0_7 = arith.constant 0 : index
    %10 = vector.load %arg2[%c1, %c0_6, %c0_7] : memref<4x64x4xf32, #tpu.memory_space<vmem>>, vector<1x64x4xf32>
    %11 = vector.shape_cast %10 : vector<1x64x4xf32> to vector<64x4xf32>
    %12 = vector.broadcast %0 : vector<1x4xf32> to vector<64x4xf32>
    %13 = arith.mulf %11, %12 : vector<64x4xf32>
    %14 = vector.broadcast %1 : vector<1x4xf32> to vector<64x4xf32>
    %15 = arith.addf %13, %14 : vector<64x4xf32>
    %cst_8 = arith.constant 0.000000e+00 : f32
    %16 = vector.broadcast %cst_8 : f32 to vector<64x4xf32>
    %17 = arith.maximumf %15, %16 : vector<64x4xf32>
    %18 = arith.addf %9, %17 : vector<64x4xf32>
    %c2 = arith.constant 2 : index
    %c0_9 = arith.constant 0 : index
    %c0_10 = arith.constant 0 : index
    %19 = vector.load %arg2[%c2, %c0_9, %c0_10] : memref<4x64x4xf32, #tpu.memory_space<vmem>>, vector<1x64x4xf32>
    %20 = vector.shape_cast %19 : vector<1x64x4xf32> to vector<64x4xf32>
    %21 = vector.broadcast %0 : vector<1x4xf32> to vector<64x4xf32>
    %22 = arith.mulf %20, %21 : vector<64x4xf32>
    %23 = vector.broadcast %1 : vector<1x4xf32> to vector<64x4xf32>
    %24 = arith.addf %22, %23 : vector<64x4xf32>
    %cst_11 = arith.constant 0.000000e+00 : f32
    %25 = vector.broadcast %cst_11 : f32 to vector<64x4xf32>
    %26 = arith.maximumf %24, %25 : vector<64x4xf32>
    %27 = arith.addf %18, %26 : vector<64x4xf32>
    %c3 = arith.constant 3 : index
    %c0_12 = arith.constant 0 : index
    %c0_13 = arith.constant 0 : index
    %28 = vector.load %arg2[%c3, %c0_12, %c0_13] : memref<4x64x4xf32, #tpu.memory_space<vmem>>, vector<1x64x4xf32>
    %29 = vector.shape_cast %28 : vector<1x64x4xf32> to vector<64x4xf32>
    %30 = vector.broadcast %0 : vector<1x4xf32> to vector<64x4xf32>
    %31 = arith.mulf %29, %30 : vector<64x4xf32>
    %32 = vector.broadcast %1 : vector<1x4xf32> to vector<64x4xf32>
    %33 = arith.addf %31, %32 : vector<64x4xf32>
    %cst_14 = arith.constant 0.000000e+00 : f32
    %34 = vector.broadcast %cst_14 : f32 to vector<64x4xf32>
    %35 = arith.maximumf %33, %34 : vector<64x4xf32>
    %36 = arith.addf %27, %35 : vector<64x4xf32>
    %c0_15 = arith.constant 0 : index
    %c0_16 = arith.constant 0 : index
    %37 = vector.load %arg5[%c0_15, %c0_16] : memref<4x2xf32, #tpu.memory_space<vmem>>, vector<4x2xf32>
    %cst_17 = arith.constant dense<0.000000e+00> : vector<64x2xf32>
    %38 = tpu.matmul %36, %37, %cst_17 {dimension_numbers = #tpu.dot_dimension_numbers<[1], [0], [0], [1], [0, 0, 1, 1], [], []>} : vector<64x4xf32>, vector<4x2xf32>, vector<64x2xf32> -> vector<64x2xf32>
    %c0_18 = arith.constant 0 : index
    %c0_19 = arith.constant 0 : index
    %39 = vector.load %arg6[%c0_18, %c0_19] : memref<64x2xf32, #tpu.memory_space<vmem>>, vector<64x2xf32>
    tpu.vector_store %arg6[%c0_18, %c0_19], %38 {strides = array<i32>} : memref<64x2xf32, #tpu.memory_space<vmem>>, vector<64x2xf32>,
    return
  }
  func.func @transform_0(%arg0: i32, %arg1: i32) -> (i32, i32, i32) {
    %c0_i32 = arith.constant 0 : i32
    %c0_i32_0 = arith.constant 0 : i32
    %c0_i32_1 = arith.constant 0 : i32
    return %c0_i32, %arg0, %c0_i32_0 : i32, i32, i32
  }
  func.func @transform_1(%arg0: i32, %arg1: i32) -> (i32, i32) {
    %c0_i32 = arith.constant 0 : i32
    %c0_i32_0 = arith.constant 0 : i32
    %c0_i32_1 = arith.constant 0 : i32
    return %c0_i32, %c0_i32_0 : i32, i32
  }
  func.func @transform_2(%arg0: i32, %arg1: i32) -> (i32, i32) {
    %c0_i32 = arith.constant 0 : i32
    %c0_i32_0 = arith.constant 0 : i32
    %c0_i32_1 = arith.constant 0 : i32
    return %c0_i32, %c0_i32_0 : i32, i32
  }
  func.func @transform_3(%arg0: i32, %arg1: i32) -> (i32, i32) {
    %c0_i32 = arith.constant 0 : i32
    %c0_i32_0 = arith.constant 0 : i32
    return %c0_i32, %arg1 : i32, i32
  }
  func.func @transform_4(%arg0: i32, %arg1: i32) -> (i32, i32) {
    %c0_i32 = arith.constant 0 : i32
    return %arg0, %arg1 : i32, i32
  }
}

</mosaic_0001>

<bundles_post_ra>
// kernel: tpu_custom_call.1
= control target key start
LH: loop header
LB: loop body
LE: loop exit
PB: predicated region body
PF: predicated region fallthrough
CT: control target
= control target key end

     0   :  { %s894_s15 = smov 0   ;;  %s896_s16 = smov 0   ;;  %s1154_s0 = inlined_call_operand.vmem [shape: f32[4,128,4], index: 0, kind: input, shape index: {}]   ;;  %s1155_s1 = inlined_call_operand.vmem [shape: f32[1,4], index: 1, kind: input, shape index: {}]   ;;  %s1156_s2 = inlined_call_operand.vmem [shape: f32[1,4], index: 2, kind: input, shape index: {}]   ;;  %s1157_s3 = inlined_call_operand.vmem [shape: f32[4,2], index: 3, kind: input, shape index: {}]   ;;  %s1158_s4 = inlined_call_operand.vmem [shape: f32[128,2], index: 4, kind: output, shape index: {}]  }
   0x1   :  { %s898_s17 = smov 0   ;;  %s900_s18 = smov 0  }
   0x2   :  { %s902_s19 = smov 0  }
   0x3 LB: > { %s26_s20 = sadd.s32 1, %s863_s18  ;;  %p40_p1 = scmp.ne.s32.totalorder %s855_s16, %s851_s15  ;;  %s867_s19 = sphi %s902_s19, %s14_s19   ;;  %s863_s18 = sphi %s900_s18, %s1162_s18   ;;  %s859_s17 = sphi %s898_s17, %s1161_s17   ;;  %s855_s16 = sphi %s896_s16, %s1160_s16   ;;  %s851_s15 = sphi %s894_s15, %s1159_s15  }
   0x4   : > { %p28_p0 = scmp.ge.s32.totalorder %s26_s20, 2  ;;  %p41_p2 = scmp.eq.s32.totalorder %s867_s19, 0 }
   0x5   : > { %s33_s22 = sadd.s32 1, %s855_s16  ;;  %p740_p5 = scmp.ge.s32.totalorder %s867_s19, 2 }
   0x6   : > { %s1164_s20 = smov (%p28_p0, %s26_s20), 0  ;;  %p42_p3 = por %p41_p2, %p40_p1 }
   0x7   : > { %s30_s21 = ssub.s32 %s863_s18, %s1164_s20  ;;  %175 = sbr.rel (%p740_p5) target bundleno = 48 (0x30), region = 28 }
   0x8   : > { %p31_p4 = scmp.eq.s32.totalorder %s30_s21, 0 }
   0xa   : > { %s929_s23 = scalar_select %p31_p4, %s855_s16, %s33_s22  }
   0xc   : > { %178 = sbr.rel (!%p42_p3) target bundleno = 48 (0x30), region = 32  ;;  %s180_s24 = sand.u32 (%p42_p3), 1, %s855_s16  }
   0xd   : > { %s783_s25 = sshll.u32 (%p42_p3), %s863_s18, 6  ;;  %s741_s26 = sshll.u32 (%p42_p3), %s180_s24, 8 }
   0xe   : > { %s937_s29 = scalar_lea.vmem (%p42_p3), %s1154_s0, %s783_s25  ;;  %s942_s30 = scalar_lea.vmem (%p42_p3), [#allocation2], %s741_s26 }
   0xf   : > { %v276_v0 = vld [vmem:[%s937_s29] sm:$0xff] (%p42_p3)  ;;  %v278_v1 = vld [vmem:[%s937_s29 + $0x8] sm:$0xff] (%p42_p3)  ;;  %v280_v2 = vld [vmem:[%s937_s29 + $0x10] sm:$0xff] (%p42_p3) }
  0x10   : > { %277 = vst [vmem:[%s942_s30] sm:$0xff] (%p42_p3), %v276_v0  ;;  %v282_v3 = vld [vmem:[%s937_s29 + $0x18] sm:$0xff] (%p42_p3)  ;;  %v284_v4 = vld [vmem:[%s937_s29 + $0x20] sm:$0xff] (%p42_p3)  ;;  %v286_v5 = vld [vmem:[%s937_s29 + $0x28] sm:$0xff] (%p42_p3) }
  0x11   : > { %279 = vst [vmem:[%s942_s30 + $0x8] sm:$0xff] %v278_v1  ;;  %v288_v6 = vld [vmem:[%s937_s29 + $0x30] sm:$0xff]  ;;  %v290_v7 = vld [vmem:[%s937_s29 + $0x38] sm:$0xff]  ;;  %v292_v8 = vld [vmem:[%s937_s29 + $0x80] sm:$0xff] }
  0x12   : > { %281 = vst [vmem:[%s942_s30 + $0x10] sm:$0xff] %v280_v2  ;;  %v294_v9 = vld [vmem:[%s937_s29 + $0x88] sm:$0xff]  ;;  %v296_v10 = vld [vmem:[%s937_s29 + $0x90] sm:$0xff]  ;;  %v298_v11 = vld [vmem:[%s937_s29 + $0x98] sm:$0xff] }
  0x13   : > { %283 = vst [vmem:[%s942_s30 + $0x18] sm:$0xff] %v282_v3  ;;  %v300_v12 = vld [vmem:[%s937_s29 + $0xa0] sm:$0xff]  ;;  %v302_v13 = vld [vmem:[%s937_s29 + $0xa8] sm:$0xff]  ;;  %v304_v14 = vld [vmem:[%s937_s29 + $0xb0] sm:$0xff] }
  0x14   : > { %285 = vst [vmem:[%s942_s30 + $0x20] sm:$0xff] %v284_v4  ;;  %v306_v15 = vld [vmem:[%s937_s29 + $0xb8] sm:$0xff]  ;;  %v308_v16 = vld [vmem:[%s937_s29 + $0x100] sm:$0xff]  ;;  %v310_v17 = vld [vmem:[%s937_s29 + $0x108] sm:$0xff] }
  0x15   : > { %287 = vst [vmem:[%s942_s30 + $0x28] sm:$0xff] %v286_v5  ;;  %v312_v18 = vld [vmem:[%s937_s29 + $0x110] sm:$0xff]  ;;  %v314_v19 = vld [vmem:[%s937_s29 + $0x118] sm:$0xff]  ;;  %v316_v20 = vld [vmem:[%s937_s29 + $0x120] sm:$0xff] }
  0x16   : > { %289 = vst [vmem:[%s942_s30 + $0x30] sm:$0xff] %v288_v6  ;;  %v318_v21 = vld [vmem:[%s937_s29 + $0x128] sm:$0xff]  ;;  %v320_v22 = vld [vmem:[%s937_s29 + $0x130] sm:$0xff]  ;;  %v322_v23 = vld [vmem:[%s937_s29 + $0x138] sm:$0xff] }
  0x17   : > { %291 = vst [vmem:[%s942_s30 + $0x38] sm:$0xff] %v290_v7  ;;  %v324_v24 = vld [vmem:[%s937_s29 + $0x180] sm:$0xff]  ;;  %v326_v25 = vld [vmem:[%s937_s29 + $0x188] sm:$0xff]  ;;  %v328_v26 = vld [vmem:[%s937_s29 + $0x190] sm:$0xff] }
  0x18   : > { %293 = vst [vmem:[%s942_s30 + $0x40] sm:$0xff] %v292_v8  ;;  %v330_v27 = vld [vmem:[%s937_s29 + $0x198] sm:$0xff]  ;;  %v332_v28 = vld [vmem:[%s937_s29 + $0x1a0] sm:$0xff]  ;;  %v334_v29 = vld [vmem:[%s937_s29 + $0x1a8] sm:$0xff] }
  0x19   : > { %295 = vst [vmem:[%s942_s30 + $0x48] sm:$0xff] %v294_v9  ;;  %v336_v30 = vld [vmem:[%s937_s29 + $0x1b0] sm:$0xff]  ;;  %v338_v31 = vld [vmem:[%s937_s29 + $0x1b8] sm:$0xff] }
  0x1a   : > { %297 = vst [vmem:[%s942_s30 + $0x50] sm:$0xff] %v296_v10 }
  0x1b   : > { %299 = vst [vmem:[%s942_s30 + $0x58] sm:$0xff] %v298_v11 }
  0x1c   : > { %301 = vst [vmem:[%s942_s30 + $0x60] sm:$0xff] %v300_v12 }
  0x1d   : > { %303 = vst [vmem:[%s942_s30 + $0x68] sm:$0xff] %v302_v13 }
  0x1e   : > { %305 = vst [vmem:[%s942_s30 + $0x70] sm:$0xff] %v304_v14 }
  0x1f   : > { %307 = vst [vmem:[%s942_s30 + $0x78] sm:$0xff] %v306_v15 }
  0x20   : > { %309 = vst [vmem:[%s942_s30 + $0x80] sm:$0xff] %v308_v16 }
  0x21   : > { %311 = vst [vmem:[%s942_s30 + $0x88] sm:$0xff] %v310_v17 }
  0x22   : > { %313 = vst [vmem:[%s942_s30 + $0x90] sm:$0xff] %v312_v18 }
  0x23   : > { %315 = vst [vmem:[%s942_s30 + $0x98] sm:$0xff] %v314_v19 }
  0x24   : > { %317 = vst [vmem:[%s942_s30 + $0xa0] sm:$0xff] %v316_v20 }
  0x25   : > { %319 = vst [vmem:[%s942_s30 + $0xa8] sm:$0xff] %v318_v21 }
  0x26   : > { %321 = vst [vmem:[%s942_s30 + $0xb0] sm:$0xff] %v320_v22 }
  0x27   : > { %323 = vst [vmem:[%s942_s30 + $0xb8] sm:$0xff] %v322_v23 }
  0x28   : > { %325 = vst [vmem:[%s942_s30 + $0xc0] sm:$0xff] %v324_v24 }
  0x29   : > { %327 = vst [vmem:[%s942_s30 + $0xc8] sm:$0xff] %v326_v25 }
  0x2a   : > { %329 = vst [vmem:[%s942_s30 + $0xd0] sm:$0xff] %v328_v26 }
  0x2b   : > { %331 = vst [vmem:[%s942_s30 + $0xd8] sm:$0xff] %v330_v27 }
  0x2c   : > { %333 = vst [vmem:[%s942_s30 + $0xe0] sm:$0xff] %v332_v28 }
  0x2d   : > { %335 = vst [vmem:[%s942_s30 + $0xe8] sm:$0xff] %v334_v29 }
  0x2e   : > { %337 = vst [vmem:[%s942_s30 + $0xf0] sm:$0xff] %v336_v30 }
  0x2f   : > { %339 = vst [vmem:[%s942_s30 + $0xf8] sm:$0xff] %v338_v31 }
  0x30 PF: > { %p744_p6 = scmp.ge.s32.totalorder %s867_s19, 1  ;;  %p344_p7 = scmp.lt.s32.totalorder %s867_s19, 3 }
  0x32   : > { %p345_p8 = pnand %p744_p6, %p344_p7 }
  0x33   : > { %s351_s7 = sand.u32 (!%p345_p8), 1, %s851_s15   ;;  %s746_s14 = sshll.u32 (!%p345_p8), %s859_s17, 3 }
  0x34   : > { %348 = sbr.rel (%p345_p8) target bundleno = 224 (0xe0), region = 70  ;;  %s745_s8 = sshll.u32 (!%p345_p8), %s351_s7, 8 }
  0x35   : > { %s1021_s13 = scalar_lea.vmem (!%p345_p8), [#allocation2], %s745_s8  ;;  %p389_p9 = scmp.lt.s32.totalorder (!%p345_p8), %s746_s14, 15 }
  0x39   : > { %v560_v32 = vld [vmem:[%s1157_s3] sm:$0xf]  ;;  %vm586_vm0 = vcmask 1043456   ;;  %v405_v42 = vld [vmem:[%s1021_s13 + $0x30] sm:$0xff]  ;;  %vm561_vm1 = vcmask 31744   ;;  %v404_v29 = vld [vmem:[%s1021_s13 + $0x28] sm:$0xff] }
  0x3a   : > { %785 = vmatpush.msk.msra.mxu2 %vm586_vm0, %v560_v32  ;;  %786 = vmatpush.msk.msra.mxu3 %vm586_vm0, %v560_v32  ;;  %v1014_v33 = vld [vmem:[%s1155_s1] ss:$0 sm:$0xff]  ;;  %v754_v43 = vld [vmem:[%s1021_s13 + $0x70] sm:$0xff]  ;;  %v753_v30 = vld [vmem:[%s1021_s13 + $0x68] sm:$0xff]  ;;  %s1166_s14 = smov (!%p389_p9, %s746_s14), 15  ;;  %vm631_vm2 = vcmask 15360  }
  0x3b   : > { %v1019_v34 = vld [vmem:[%s1156_s2] ss:$0 sm:$0xff]  ;;  %772 = vmatpush.msk.msra.mxu0 %vm586_vm0, %v560_v32  ;;  %784 = vmatpush.msk.msra.mxu1 %vm586_vm0, %v560_v32  ;;  %v416_v45 = vmul.f32 %v1014_v33, %v405_v42  ;;  %v452_v46 = vmul.f32 %v1014_v33, %v754_v43  ;;  %v762_v47 = vld [vmem:[%s1021_s13 + $0xb0] sm:$0xff]  ;;  %v761_v31 = vld [vmem:[%s1021_s13 + $0xa8] sm:$0xff]  ;;  %s747_s15 = sshll.u32 %s1166_s14, 3 }
  0x3c   : > { %v403_v35 = vld [vmem:[%s1021_s13 + $0x20] sm:$0xff]  ;;  %v770_v48 = vld [vmem:[%s1021_s13 + $0xf0] sm:$0xff]  ;;  %v493_v52 = vmul.f32 %v1014_v33, %v762_v47  ;;  %s395_s24 = scalar_lea.vmem %s1158_s4, %s747_s15 }
  0x3d   : > { %v752_v36 = vld [vmem:[%s1021_s13 + $0x60] sm:$0xff]  ;;  %v414_v38 = vmul.f32 %v1014_v33, %v403_v35  ;;  %v427_v54 = vadd.f32 %v1019_v34, %v416_v45  ;;  %v460_v55 = vadd.f32 %v1019_v34, %v452_v46  ;;  %v534_v56 = vmul.f32 %v1014_v33, %v770_v48  ;;  %v401_v5 = vld [vmem:[%s1021_s13 + $0x10] sm:$0xff] }
  0x3e   : > { %v760_v37 = vld [vmem:[%s1021_s13 + $0xa0] sm:$0xff]  ;;  %v450_v39 = vmul.f32 %v1014_v33, %v752_v36  ;;  %v501_v62 = vadd.f32 %v1019_v34, %v493_v52  ;;  %v750_v10 = vld [vmem:[%s1021_s13 + $0x50] sm:$0xff]  ;;  %v412_v18 = vmul.f32 %v1014_v33, %v401_v5  ;;  %v451_v45 = vmul.f32 %v1014_v33, %v753_v30  ;;  %v767_v30 = vld [vmem:[%s1021_s13 + $0xd8] sm:$0xff] }
  0x3f   : > { %v491_v40 = vmul.f32 %v1014_v33, %v760_v37  ;;  %v768_v41 = vld [vmem:[%s1021_s13 + $0xe0] sm:$0xff]  ;;  %v425_v49 = vadd.f32 %v1019_v34, %v414_v38  ;;  %v435_v2 = vmax.f32 %v427_v54, 0.0  ;;  %v468_v3 = vmax.f32 %v460_v55, 0.0  ;;  %v758_v23 = vld [vmem:[%s1021_s13 + $0x90] sm:$0xff]  ;;  %v769_v38 = vld [vmem:[%s1021_s13 + $0xe8] sm:$0xff] }
  0x40   : > { %v532_v44 = vmul.f32 %v1014_v33, %v768_v41  ;;  %v458_v50 = vadd.f32 %v1019_v34, %v450_v39  ;;  %v399_v57 = vld [vmem:[%s1021_s13] sm:$0xff]  ;;  %v542_v4 = vadd.f32 %v1019_v34, %v534_v56  ;;  %v509_v7 = vmax.f32 %v501_v62, 0.0  ;;  %v766_v24 = vld [vmem:[%s1021_s13 + $0xd0] sm:$0xff]  ;;  %v755_v56 = vld [vmem:[%s1021_s13 + $0x78] sm:$0xff] }
  0x41   : > { %v499_v51 = vadd.f32 %v1019_v34, %v491_v40  ;;  %v748_v58 = vld [vmem:[%s1021_s13 + $0x40] sm:$0xff]  ;;  %v433_v59 = vmax.f32 %v425_v49, 0.0  ;;  %v410_v8 = vmul.f32 %v1014_v33, %v399_v57  ;;  %v476_v11 = vadd.f32 %v468_v3, %v435_v2  ;;  %v763_v57 = vld [vmem:[%s1021_s13 + $0xb8] sm:$0xff] }
  0x42   : > { %v540_v53 = vadd.f32 %v1019_v34, %v532_v44  ;;  %v466_v60 = vmax.f32 %v458_v50, 0.0  ;;  %v756_v63 = vld [vmem:[%s1021_s13 + $0x80] sm:$0xff]  ;;  %v446_v9 = vmul.f32 %v1014_v33, %v748_v58  ;;  %v550_v12 = vmax.f32 %v542_v4, 0.0  ;;  %v771_v62 = vld [vmem:[%s1021_s13 + $0xf8] sm:$0xff]  ;;  %v749_v4 = vld [vmem:[%s1021_s13 + $0x48] sm:$0xff] }
  0x43   : > { %v507_v61 = vmax.f32 %v499_v51, 0.0  ;;  %v764_v0 = vld [vmem:[%s1021_s13 + $0xc0] sm:$0xff]  ;;  %v487_v13 = vmul.f32 %v1014_v33, %v756_v63  ;;  %v421_v16 = vadd.f32 %v1019_v34, %v410_v8  ;;  %v517_v19 = vadd.f32 %v509_v7, %v476_v11  ;;  %v406_v51 = vld [vmem:[%s1021_s13 + $0x38] sm:$0xff]  ;;  %v400_v63 = vld [vmem:[%s1021_s13 + $0x8] sm:$0xff] }
  0x44   : > { %v548_v1 = vmax.f32 %v540_v53, 0.0  ;;  %v474_v6 = vadd.f32 %v466_v60, %v433_v59  ;;  %v528_v14 = vmul.f32 %v1014_v33, %v764_v0  ;;  %v454_v17 = vadd.f32 %v1019_v34, %v446_v9 }
  0x45   : > { %v495_v20 = vadd.f32 %v1019_v34, %v487_v13  ;;  %v448_v22 = vmul.f32 %v1014_v33, %v750_v10  ;;  %v429_v26 = vmax.f32 %v421_v16, 0.0  ;;  %v423_v28 = vadd.f32 %v1019_v34, %v412_v18  ;;  %v757_v13 = vld [vmem:[%s1021_s13 + $0x88] sm:$0xff] }
  0x46   : > { %v515_v15 = vadd.f32 %v507_v61, %v474_v6  ;;  %v536_v21 = vadd.f32 %v1019_v34, %v528_v14  ;;  %v462_v27 = vmax.f32 %v454_v17, 0.0  ;;  %v558_v32 = vadd.f32 %v550_v12, %v517_v19  ;;  %v765_v18 = vld [vmem:[%s1021_s13 + $0xc8] sm:$0xff] }
  0x47   : > { %v503_v35 = vmax.f32 %v495_v20, 0.0  ;;  %v456_v37 = vadd.f32 %v1019_v34, %v448_v22  ;;  %v431_v40 = vmax.f32 %v423_v28, 0.0  ;;  %v489_v41 = vmul.f32 %v1014_v33, %v758_v23  ;;  %v402_v23 = vld [vmem:[%s1021_s13 + $0x18] sm:$0xff] }
  0x48   : > { %v556_v25 = vadd.f32 %v548_v1, %v515_v15  ;;  %v544_v36 = vmax.f32 %v536_v21, 0.0  ;;  %v470_v39 = vadd.f32 %v462_v27, %v429_v26  ;;  %v530_v42 = vmul.f32 %v1014_v33, %v766_v24  ;;  %779 = vmatmul.msk.f32.vlgmr.msra.gmra.mxu3 %vm561_vm1, %v558_v32  ;;  %v751_v28 = vld [vmem:[%s1021_s13 + $0x58] sm:$0xff] }
  0x49   : > { %v464_v43 = vmax.f32 %v456_v37, 0.0  ;;  %v415_v44 = vmul.f32 %v1014_v33, %v404_v29  ;;  %v492_v46 = vmul.f32 %v1014_v33, %v761_v31  ;;  %v497_v48 = vadd.f32 %v1019_v34, %v489_v41  ;;  %v759_v29 = vld [vmem:[%s1021_s13 + $0x98] sm:$0xff] }
  0x4a   : > { %777 = vmatmul.msk.f32.vlgmr.msra.gmra.mxu2 %vm561_vm1, %v556_v25  ;;  %v511_v47 = vadd.f32 %v503_v35, %v470_v39  ;;  %v538_v49 = vadd.f32 %v1019_v34, %v530_v42  ;;  %v533_v50 = vmul.f32 %v1014_v33, %v769_v38  ;;  %v459_v54 = vadd.f32 %v1019_v34, %v451_v45 }
  0x4b   : > { %v472_v52 = vadd.f32 %v464_v43, %v431_v40  ;;  %v426_v53 = vadd.f32 %v1019_v34, %v415_v44  ;;  %v500_v55 = vadd.f32 %v1019_v34, %v492_v46  ;;  %v505_v59 = vmax.f32 %v497_v48, 0.0 }
  0x4c   : > { %v552_v58 = vadd.f32 %v544_v36, %v511_v47  ;;  %v546_v60 = vmax.f32 %v538_v49, 0.0  ;;  %v541_v61 = vadd.f32 %v1019_v34, %v533_v50  ;;  %v467_v1 = vmax.f32 %v459_v54, 0.0 }
  0x4d   : > { %v434_v0 = vmax.f32 %v426_v53, 0.0  ;;  %v508_v2 = vmax.f32 %v500_v55, 0.0  ;;  %v417_v3 = vmul.f32 %v1014_v33, %v406_v51  ;;  %v513_v5 = vadd.f32 %v505_v59, %v472_v52 }
  0x4e   : > { %773 = vmatmul.msk.f32.vlgmr.msra.gmra.mxu0 %vm561_vm1, %v552_v58  ;;  %v549_v6 = vmax.f32 %v541_v61, 0.0  ;;  %v453_v7 = vmul.f32 %v1014_v33, %v755_v56  ;;  %v494_v8 = vmul.f32 %v1014_v33, %v763_v57  ;;  %v535_v11 = vmul.f32 %v1014_v33, %v771_v62 }
  0x4f   : > { %v475_v9 = vadd.f32 %v467_v1, %v434_v0  ;;  %v428_v10 = vadd.f32 %v1019_v34, %v417_v3  ;;  %v411_v12 = vmul.f32 %v1014_v33, %v400_v63  ;;  %v554_v14 = vadd.f32 %v546_v60, %v513_v5 }
  0x50   : > { %v461_v15 = vadd.f32 %v1019_v34, %v453_v7  ;;  %v502_v16 = vadd.f32 %v1019_v34, %v494_v8  ;;  %v447_v17 = vmul.f32 %v1014_v33, %v749_v4  ;;  %v543_v21 = vadd.f32 %v1019_v34, %v535_v11 }
  0x51   : > { %v516_v19 = vadd.f32 %v508_v2, %v475_v9  ;;  %v436_v20 = vmax.f32 %v428_v10, 0.0  ;;  %v422_v22 = vadd.f32 %v1019_v34, %v411_v12  ;;  %775 = vmatmul.msk.f32.vlgmr.msra.gmra.mxu1 %vm561_vm1, %v554_v14  ;;  %v488_v27 = vmul.f32 %v1014_v33, %v757_v13 }
  0x52   : > { %v469_v24 = vmax.f32 %v461_v15, 0.0  ;;  %v510_v25 = vmax.f32 %v502_v16, 0.0  ;;  %v455_v26 = vadd.f32 %v1019_v34, %v447_v17  ;;  %v551_v32 = vmax.f32 %v543_v21, 0.0 }
  0x53   : > { %v557_v31 = vadd.f32 %v549_v6, %v516_v19  ;;  %v430_v35 = vmax.f32 %v422_v22, 0.0  ;;  %v529_v36 = vmul.f32 %v1014_v33, %v765_v18  ;;  %v496_v39 = vadd.f32 %v1019_v34, %v488_v27 }
  0x54   : > { %v477_v37 = vadd.f32 %v469_v24, %v436_v20  ;;  %v463_v38 = vmax.f32 %v455_v26, 0.0  ;;  %v413_v40 = vmul.f32 %v1014_v33, %v402_v23  ;;  %v449_v42 = vmul.f32 %v1014_v33, %v751_v28 }
  0x55   : > { %778 = vmatmul.msk.f32.gmra.mxu2 %vm561_vm1, %v557_v31  ;;  %v537_v41 = vadd.f32 %v1019_v34, %v529_v36  ;;  %v490_v43 = vmul.f32 %v1014_v33, %v759_v29  ;;  %v531_v44 = vmul.f32 %v1014_v33, %v767_v30  ;;  %v504_v47 = vmax.f32 %v496_v39, 0.0 }
  0x56   : > { %v518_v45 = vadd.f32 %v510_v25, %v477_v37  ;;  %v471_v46 = vadd.f32 %v463_v38, %v430_v35  ;;  %v424_v48 = vadd.f32 %v1019_v34, %v413_v40  ;;  %v457_v50 = vadd.f32 %v1019_v34, %v449_v42 }
  0x57   : > { %v545_v49 = vmax.f32 %v537_v41, 0.0  ;;  %v498_v51 = vadd.f32 %v1019_v34, %v490_v43  ;;  %v539_v52 = vadd.f32 %v1019_v34, %v531_v44 }
  0x58   : > { %v559_v53 = vadd.f32 %v551_v32, %v518_v45  ;;  %v512_v54 = vadd.f32 %v504_v47, %v471_v46  ;;  %v432_v55 = vmax.f32 %v424_v48, 0.0  ;;  %v465_v56 = vmax.f32 %v457_v50, 0.0 }
  0x59   : > { %v506_v57 = vmax.f32 %v498_v51, 0.0  ;;  %v547_v59 = vmax.f32 %v539_v52, 0.0 }
  0x5a   : > { %780 = vmatmul.msk.f32.gmra.mxu3 %vm561_vm1, %v559_v53  ;;  %v553_v33 = vadd.f32 %v545_v49, %v512_v54  ;;  %v473_v58 = vadd.f32 %v465_v56, %v432_v55 }
  0x5c   : > { %774 = vmatmul.msk.f32.gmra.mxu0 %vm561_vm1, %v553_v33  ;;  %v514_v60 = vadd.f32 %v506_v57, %v473_v58 }
  0x5e   : > { %v555_v61 = vadd.f32 %v547_v59, %v514_v60 }
  0x60   : > { %776 = vmatmul.msk.f32.gmra.mxu1 %vm561_vm1, %v555_v61 }
  0xcb   : > { %v607_v34 = vpop.f32.mrf.mxu0  ;;  %v625_v63 = vpop.f32.mrf.mxu3 }
  0xcc   : > { %632 = vst.msk [vmem:[%s395_s24] sm:$0xff] %vm631_vm2, %v607_v34 }
  0xcd   : > { %v619_v62 = vpop.f32.mrf.mxu2  ;;  %638 = vst.msk [vmem:[%s395_s24 + $0x30] sm:$0xff] %vm631_vm2, %v625_v63 }
  0xce   : > { %636 = vst.msk [vmem:[%s395_s24 + $0x20] sm:$0xff] %vm631_vm2, %v619_v62  ;;  %v613_v0 = vpop.f32.mrf.mxu1 }
  0xcf   : > { %634 = vst.msk [vmem:[%s395_s24 + $0x10] sm:$0xff] %vm631_vm2, %v613_v0 }
  0xd8   : > { %v622_v1 = vpop.f32.mrf.mxu2 }
  0xd9   : > { %v610_v2 = vpop.f32.mrf.mxu0  ;;  %637 = vst.msk [vmem:[%s395_s24 + $0x28] sm:$0xff] %vm631_vm2, %v622_v1 }
  0xda   : > { %633 = vst.msk [vmem:[%s395_s24 + $0x8] sm:$0xff] %vm631_vm2, %v610_v2 }
  0xdd   : > { %v628_v3 = vpop.f32.mrf.mxu3  ;;  %v616_v4 = vpop.f32.mrf.mxu1 }
  0xde   : > { %639 = vst.msk [vmem:[%s395_s24 + $0x38] sm:$0xff] %vm631_vm2, %v628_v3 }
  0xdf   : > { %635 = vst.msk [vmem:[%s395_s24 + $0x18] sm:$0xff] %vm631_vm2, %v616_v4 }
  0xe0 PF: > { %s14_s19 = sadd.s32 1, %s867_s19   ;;  %s1159_s15 = smov %s855_s16 }
  0xe1   : > { %p11_p10 = scmp.ge.s32.totalorder %s14_s19, 4   ;;  %s1160_s16 = smov %s929_s23 }
  0xe2   : > { %s1161_s17 = smov %s863_s18  ;;  %s1162_s18 = smov %s1164_s20 }
  0xe3   :  { %13 = sbr.rel (!%p11_p10) target bundleno = 3 (0x3), region = 115 }

</bundles_post_ra>
